<compile_context>
chip_gen: v7x
topology: tpu7x:2x2x1
jax: 0.10.0
libtpu: 0.0.40
codegen_flags: <defaults>
</compile_context>

<pallas_src>
import functools

import jax
import jax.numpy as jnp
from jax import lax
from jax.experimental import pallas as pl
from jax.experimental.pallas import tpu as pltpu


def _round_up(x, m):
    return (x + m - 1) // m * m


_NEG_BIG = -1e30  # finite "minus infinity" -> no NaN even for all-masked rows


def _nl_flash_kernel(th_ref, ph_ref, g_ref, xq_ref, wz_ref, bz_ref, o_ref,
                     m_ref, l_ref, acc_ref,
                     *, tk, s_valid, masked, bf16_exp):
    """One (batch, query-tile, key-tile) grid step of the non-local block."""
    ki = pl.program_id(2)
    nk = pl.num_programs(2)

    @pl.when(ki == 0)
    def _init():
        m_ref[...] = jnp.full(m_ref.shape, _NEG_BIG, jnp.float32)
        l_ref[...] = jnp.zeros(l_ref.shape, jnp.float32)
        acc_ref[...] = jnp.zeros(acc_ref.shape, jnp.float32)

    # Affinity: theta (TQ, Ci) x phi^T (Ci, TK) -> (TQ, TK).  phi is stored
    # pre-transposed in HBM, so this is a natural MXU contraction (no vxpose).
    s = jnp.dot(th_ref[0], ph_ref[0], preferred_element_type=jnp.float32)

    if masked:  # mask keys that are zero-padding beyond the true S
        key_idx = ki * tk + lax.broadcasted_iota(jnp.int32, s.shape, 1)
        s = jnp.where(key_idx < s_valid, s, _NEG_BIG)

    # Online-softmax update (f32 state, unnormalized accumulation).
    m_prev = m_ref[...]
    m_new = jnp.maximum(m_prev, jnp.max(s, axis=-1, keepdims=True))
    alpha = jnp.exp(m_prev - m_new)
    if bf16_exp:
        # v6e / v7x: bf16 EUP -> ~2x exp throughput, half the p-tile footprint;
        # p is consumed as bf16 by the PV matmul anyway.
        p_mm = jnp.exp((s - m_new).astype(jnp.bfloat16))
        p_sum = jnp.sum(p_mm.astype(jnp.float32), axis=-1, keepdims=True)
    else:
        # v5e has no bf16 EUP/VPU -> keep the exp in f32.
        p_f32 = jnp.exp(s - m_new)
        p_sum = jnp.sum(p_f32, axis=-1, keepdims=True)
        p_mm = p_f32.astype(jnp.bfloat16)
    l_ref[...] = alpha * l_ref[...] + p_sum
    # NOTE: with Ci padded to 128 this PV matmul only half-fills the 256-wide
    # MXU on v6e/v7x; dominant QK^T matmul (N = TK >= 256) is unaffected.
    acc_ref[...] = alpha * acc_ref[...] + jnp.dot(
        p_mm, g_ref[0], preferred_element_type=jnp.float32)
    m_ref[...] = m_new

    @pl.when(ki == nk - 1)
    def _finalize():
        # Deferred softmax normalization, fused W_z conv + folded BN, residual.
        y = acc_ref[...] * pl.reciprocal(l_ref[...], approx=True)   # (TQ, Ci)
        wy = jnp.dot(y.astype(jnp.bfloat16), wz_ref[...],
                     preferred_element_type=jnp.float32) + bz_ref[...]
        o_ref[0] = (wy + xq_ref[0]).astype(o_ref.dtype)


def _eup_supports_bf16():
    """True on TPU generations with a bf16 EUP/VPU (v6e and later)."""
    try:
        kind = jax.devices()[0].device_kind.lower()
    except Exception:
        return False
    if "tpu" not in kind:
        return False
    for old in ("v2", "v3", "v4", "v5"):
        if old in kind:
            return False
    return True


def nl_block_embedded(x, params, eps=1e-5, tq=512, tk=256):
    """NLBlockND forward (embedded mode, inference BN).  x: (N, C, T, H, W)."""
    N, C, T, H, W = x.shape
    S = T * H * W
    Ci = params["wg"].shape[1]

    Cp = _round_up(C, 128)            # lane-dense channel widths
    Cip = _round_up(Ci, 128)

    # Decoupled tile sizes: TQ governs how often the key stream is re-read,
    # TK is the reduction chunk.  TQ is kept a multiple of TK.
    if S <= tk:
        TK = _round_up(S, 8)
        TQ = TK
    else:
        TK = tk
        TQ = min(tq, _round_up(S, TK))
        TQ = max(TK, (TQ // TK) * TK)
    Sp_q = _round_up(S, TQ)           # q-side padding (theta / x / out)
    Sp_k = _round_up(S, TK)           # k-side padding (phi / g): < TK of pad,
    masked = Sp_k != S                # so a key tile always has a valid key.

    # NCDHW -> channels-last (N, S, C).
    # TODO(synk): if the surrounding model is kept channels-last these two
    # transposes (and their HBM round trips) disappear entirely.
    x_sc = jnp.transpose(x, (0, 2, 3, 4, 1)).reshape(N, S, C)

    # ---- Hoisted QKV projection (once per batch, plain XLA matmuls). -------
    xb = x_sc.astype(jnp.bfloat16)

    def proj(w, b):   # (N, S, C) x (C, Ci) -> (N, S, Ci), f32 accumulation
        return jnp.einsum('nsc,ci->nsi', xb, w.astype(jnp.bfloat16),
                          preferred_element_type=jnp.float32) + b

    theta = proj(params["wt"], params["bt"]).astype(jnp.bfloat16)   # (N,S,Ci)
    phi_t = jnp.transpose(
        proj(params["wp"], params["bp"]), (0, 2, 1)).astype(jnp.bfloat16)
    g_x = proj(params["wg"], params["bg"]).astype(jnp.bfloat16)     # (N,S,Ci)

    theta = jnp.pad(theta, ((0, 0), (0, Sp_q - S), (0, Cip - Ci)))
    phi_t = jnp.pad(phi_t, ((0, 0), (0, Cip - Ci), (0, Sp_k - S)))
    g_x = jnp.pad(g_x, ((0, 0), (0, Sp_k - S), (0, Cip - Ci)))
    # f32 q-side copy of x for the residual add (full precision).
    x_q = jnp.pad(x_sc, ((0, 0), (0, Sp_q - S), (0, Cp - C)))

    # ---- Fold W_z bias + inference BatchNorm into one weight/bias. ---------
    bn_scale = params["bn_gamma"] / jnp.sqrt(params["bn_var"] + eps)
    bn_shift = params["bn_beta"] - params["bn_mean"] * bn_scale
    wz_eff = params["wz"] * bn_scale[None, :]
    bz_eff = params["bz"] * bn_scale + bn_shift
    w_z = jnp.pad(wz_eff, ((0, Cip - Ci), (0, Cp - C))).astype(jnp.bfloat16)
    b_z = jnp.pad(bz_eff, (0, Cp - C)).reshape(1, Cp).astype(jnp.float32)

    # v7x note: with N and Sp_q//TQ both "parallel", make sure at least one of
    # them has extent >= 2 so both TensorCores get work.
    grid = (N, Sp_q // TQ, Sp_k // TK)

    kernel = functools.partial(_nl_flash_kernel, tk=TK, s_valid=S,
                               masked=masked, bf16_exp=_eup_supports_bf16())

    def full(shape):
        return pl.BlockSpec(shape, lambda n, q, k: (0, 0))

    # VMEM budget from the actual tile sizes; capped at 75% of physical VMEM
    # per core (valid on v7x's 64 MiB as well as v5e/v6e's 128 MiB).
    vmem_bytes = (
        2 * TQ * Cip * 2                     # theta blocks (bf16, 2-buffered)
        + 2 * Cip * TK * 2 + 2 * TK * Cip * 2  # phi / g blocks (bf16)
        + 2 * TQ * Cp * 4 + 2 * TQ * Cp * 4    # x_q / out blocks (f32)
        + 2 * Cip * Cp * 2 + 2 * Cp * 4        # W_z / bias
        + TQ * Cip * 4 + 2 * TQ * 4            # acc / m / l scratch
        + 3 * TQ * TK * 4                      # score / exp temporaries
    )
    try:
        vmem_cap = int(pltpu.get_tpu_info().vmem_capacity_bytes)
    except Exception:
        vmem_cap = 64 << 20                    # conservative (v7x per-core)
    vmem_limit = min(max(int(vmem_bytes * 2), 32 << 20), vmem_cap * 3 // 4)

    n_q = Sp_q // TQ
    cost = pl.CostEstimate(
        flops=2 * N * (2 * Sp_q * Sp_k * Cip + Sp_q * Cip * Cp),
        transcendentals=N * Sp_q * Sp_k,
        bytes_accessed=(N * (Sp_q * Cip * 2            # theta, once
                             + 2 * Sp_q * Cp * 4       # x_q read + out write
                             + n_q * Sp_k * 2 * Cip * 2)  # phi+g re-read n_q x
                        + Cip * Cp * 2 + Cp * 4),
    )

    out = pl.pallas_call(
        kernel,
        out_shape=jax.ShapeDtypeStruct((N, Sp_q, Cp), x.dtype),
        grid=grid,
        in_specs=[
            pl.BlockSpec((1, TQ, Cip), lambda n, q, k: (n, q, 0)),   # theta
            # TODO(synk): on v7x, if the k-side DMA shows up exposed, add
            # pipeline_mode=pl.Buffered(3) to the phi / g BlockSpecs.
            pl.BlockSpec((1, Cip, TK), lambda n, q, k: (n, 0, k)),   # phi^T
            pl.BlockSpec((1, TK, Cip), lambda n, q, k: (n, k, 0)),   # g
            pl.BlockSpec((1, TQ, Cp), lambda n, q, k: (n, q, 0)),    # x (resid)
            full((Cip, Cp)),                                         # W_z*BN
            full((1, Cp)),                                           # bias
        ],
        out_specs=pl.BlockSpec((1, TQ, Cp), lambda n, q, k: (n, q, 0)),
        scratch_shapes=[
            pltpu.VMEM((TQ, 1), jnp.float32),      # running max
            pltpu.VMEM((TQ, 1), jnp.float32),      # running sum
            pltpu.VMEM((TQ, Cip), jnp.float32),    # f32 output accumulator
        ],
        compiler_params=pltpu.CompilerParams(
            dimension_semantics=("parallel", "parallel", "arbitrary"),
            vmem_limit_bytes=vmem_limit),
        cost_estimate=cost,
    )(theta, phi_t, g_x, x_q, w_z, b_z)

    out = out[:, :S, :C].reshape(N, T, H, W, C)
    return jnp.transpose(out, (0, 4, 1, 2, 3))


def nl_block_embedded_ref(x, params, eps=1e-5):
    """Pure-JAX f32 reference mirroring the PyTorch forward (embedded mode)."""
    N, C = x.shape[0], x.shape[1]
    S = 1
    for d in x.shape[2:]:
        S *= d
    xf = x.reshape(N, C, S)

    def proj(w, b):  # 1x1 conv: (N, C, S) x (C, Co) -> (N, Co, S)
        return jnp.einsum('ncs,co->nos', xf, w) + b[None, :, None]

    g_x = proj(params["wg"], params["bg"]).transpose(0, 2, 1)     # (N, S, Ci)
    th = proj(params["wt"], params["bt"]).transpose(0, 2, 1)      # (N, S, Ci)
    ph = proj(params["wp"], params["bp"])                         # (N, Ci, S)
    f = jnp.einsum('nsc,nct->nst', th, ph)                        # (N, S, S)
    p = jax.nn.softmax(f, axis=-1)
    y = jnp.einsum('nst,ntc->nsc', p, g_x)                        # (N, S, Ci)
    wy = jnp.einsum('nsc,co->nso', y, params["wz"]) + params["bz"][None, None, :]
    scale = params["bn_gamma"] / jnp.sqrt(params["bn_var"] + eps)
    shift = params["bn_beta"] - params["bn_mean"] * scale
    wy = wy * scale[None, None, :] + shift[None, None, :]
    return wy.transpose(0, 2, 1).reshape(x.shape) + x


if __name__ == "__main__":
    key = jax.random.PRNGKey(0)
    N, C, T, H, W = 2, 8, 2, 4, 4          # (N, C, T, H, W), dimension=3
    Ci = C // 2                            # inter_channels = in_channels // 2
    ks = jax.random.split(key, 12)

    x = jax.random.normal(ks[0], (N, C, T, H, W), jnp.float32)

    params = dict(
        wg=jax.random.normal(ks[1], (C, Ci), jnp.float32) * 0.2,
        bg=jax.random.normal(ks[2], (Ci,), jnp.float32) * 0.1,
        wt=jax.random.normal(ks[3], (C, Ci), jnp.float32) * 0.2,
        bt=jax.random.normal(ks[4], (Ci,), jnp.float32) * 0.1,
        wp=jax.random.normal(ks[5], (C, Ci), jnp.float32) * 0.2,
        bp=jax.random.normal(ks[6], (Ci,), jnp.float32) * 0.1,
        wz=jax.random.normal(ks[7], (Ci, C), jnp.float32) * 0.2,
        bz=jax.random.normal(ks[8], (C,), jnp.float32) * 0.1,
        # NOTE: the PyTorch module initializes BN gamma/beta to 0 (making
        # W_y == 0 and z == x).  We use nonzero deterministic values so the
        # full compute path is exercised; semantics are identical.
        bn_gamma=jax.random.normal(ks[9], (C,), jnp.float32) * 0.5 + 1.0,
        bn_beta=jax.random.normal(ks[10], (C,), jnp.float32) * 0.1,
        bn_mean=jnp.zeros((C,), jnp.float32),   # BN running stats (inference)
        bn_var=jnp.ones((C,), jnp.float32),
    )

    out = jax.block_until_ready(nl_block_embedded(x, params))
    ref = nl_block_embedded_ref(x, params)

    max_err = float(jnp.max(jnp.abs(out - ref)))
    assert out.shape == x.shape, (out.shape, x.shape)
    # bf16 MXU operands / projections + approx reciprocal -> ~1e-2-level error.
    assert jnp.allclose(out, ref, atol=5e-2, rtol=5e-2), max_err
    print("KERNEL_OK")
</pallas_src>

<mosaic_0001>
module attributes {stable_mosaic.version = 11 : i64} {
  func.func @_nl_flash_kernel(%arg0: i32, %arg1: i32, %arg2: i32, %arg3: memref<1x32x128xbf16, #tpu.memory_space<vmem>>, %arg4: memref<1x128x32xbf16, #tpu.memory_space<vmem>>, %arg5: memref<1x32x128xbf16, #tpu.memory_space<vmem>>, %arg6: memref<1x32x128xf32, #tpu.memory_space<vmem>>, %arg7: memref<128x128xbf16, #tpu.memory_space<vmem>>, %arg8: memref<1x128xf32, #tpu.memory_space<vmem>>, %arg9: memref<1x32x128xf32, #tpu.memory_space<vmem>>, %arg10: memref<32x1xf32, #tpu.memory_space<vmem>>, %arg11: memref<32x1xf32, #tpu.memory_space<vmem>>, %arg12: memref<32x128xf32, #tpu.memory_space<vmem>>) attributes {dimension_semantics = [#tpu.dimension_semantics<parallel>, #tpu.dimension_semantics<parallel>, #tpu.dimension_semantics<arbitrary>], iteration_bounds = array<i64: 2, 1, 1>, scalar_prefetch = 0 : i64, scratch_operands = 3 : i64, tpu.core_type = #tpu.core_type<tc>, window_params = [{transform_indices = @transform_0, window_bounds = array<i64: 1, 32, 128>}, {transform_indices = @transform_1, window_bounds = array<i64: 1, 128, 32>}, {transform_indices = @transform_2, window_bounds = array<i64: 1, 32, 128>}, {transform_indices = @transform_3, window_bounds = array<i64: 1, 32, 128>}, {pipeline_mode = #tpu.pipeline_mode<synchronous>, transform_indices = @transform_4, window_bounds = array<i64: 128, 128>}, {pipeline_mode = #tpu.pipeline_mode<synchronous>, transform_indices = @transform_5, window_bounds = array<i64: 1, 128>}, {transform_indices = @transform_6, window_bounds = array<i64: 1, 32, 128>}]} {
    %c0_i32 = arith.constant 0 : i32
    %0 = arith.cmpi eq, %arg2, %c0_i32 : i32
    %1 = arith.extui %0 : i1 to i32
    %c0_i32_0 = arith.constant 0 : i32
    %2 = arith.cmpi ne, %1, %c0_i32_0 : i32
    scf.if %2 {
      %cst_26 = arith.constant -1.000000e+30 : f32
      %36 = vector.broadcast %cst_26 : f32 to vector<32x1xf32>
      %c0_27 = arith.constant 0 : index
      %c0_28 = arith.constant 0 : index
      %37 = vector.load %arg10[%c0_27, %c0_28] : memref<32x1xf32, #tpu.memory_space<vmem>>, vector<32x1xf32>
      tpu.vector_store %arg10[%c0_27, %c0_28], %36 {strides = array<i32>} : memref<32x1xf32, #tpu.memory_space<vmem>>, vector<32x1xf32>,
      %cst_29 = arith.constant 0.000000e+00 : f32
      %38 = vector.broadcast %cst_29 : f32 to vector<32x1xf32>
      %c0_30 = arith.constant 0 : index
      %c0_31 = arith.constant 0 : index
      %39 = vector.load %arg11[%c0_30, %c0_31] : memref<32x1xf32, #tpu.memory_space<vmem>>, vector<32x1xf32>
      tpu.vector_store %arg11[%c0_30, %c0_31], %38 {strides = array<i32>} : memref<32x1xf32, #tpu.memory_space<vmem>>, vector<32x1xf32>,
      %cst_32 = arith.constant 0.000000e+00 : f32
      %40 = vector.broadcast %cst_32 : f32 to vector<32x128xf32>
      %c0_33 = arith.constant 0 : index
      %c0_34 = arith.constant 0 : index
      %41 = vector.load %arg12[%c0_33, %c0_34] : memref<32x128xf32, #tpu.memory_space<vmem>>, vector<32x128xf32>
      tpu.vector_store %arg12[%c0_33, %c0_34], %40 {strides = array<i32>} : memref<32x128xf32, #tpu.memory_space<vmem>>, vector<32x128xf32>,
    } else {
    }
    %c0 = arith.constant 0 : index
    %c0_1 = arith.constant 0 : index
    %c0_2 = arith.constant 0 : index
    %3 = vector.load %arg3[%c0, %c0_1, %c0_2] : memref<1x32x128xbf16, #tpu.memory_space<vmem>>, vector<1x32x128xbf16>
    %4 = vector.shape_cast %3 : vector<1x32x128xbf16> to vector<32x128xbf16>
    %c0_3 = arith.constant 0 : index
    %c0_4 = arith.constant 0 : index
    %c0_5 = arith.constant 0 : index
    %5 = vector.load %arg4[%c0_3, %c0_4, %c0_5] : memref<1x128x32xbf16, #tpu.memory_space<vmem>>, vector<1x128x32xbf16>
    %6 = vector.shape_cast %5 : vector<1x128x32xbf16> to vector<128x32xbf16>
    %cst = arith.constant dense<0.000000e+00> : vector<32x32xf32>
    %7 = tpu.matmul %4, %6, %cst {dimension_numbers = #tpu.dot_dimension_numbers<[1], [0], [0], [1], [0, 0, 1, 1], [], []>} : vector<32x128xbf16>, vector<128x32xbf16>, vector<32x32xf32> -> vector<32x32xf32>
    %c0_6 = arith.constant 0 : index
    %c0_7 = arith.constant 0 : index
    %8 = vector.load %arg10[%c0_6, %c0_7] : memref<32x1xf32, #tpu.memory_space<vmem>>, vector<32x1xf32>
    %cst_8 = arith.constant dense<0xFF800000> : vector<32xf32>
    %9 = vector.multi_reduction <maximumf>, %7, %cst_8 [1] : vector<32x32xf32> to vector<32xf32>
    %10 = vector.shape_cast %9 : vector<32xf32> to vector<32x1xf32>
    %11 = arith.maximumf %8, %10 : vector<32x1xf32>
    %12 = arith.subf %8, %11 : vector<32x1xf32>
    %13 = math.exp %12 : vector<32x1xf32>
    %14 = vector.broadcast %11 : vector<32x1xf32> to vector<32x32xf32>
    %15 = arith.subf %7, %14 : vector<32x32xf32>
    %16 = math.exp %15 : vector<32x32xf32>
    %cst_9 = arith.constant dense<0.000000e+00> : vector<32xf32>
    %17 = vector.multi_reduction <add>, %16, %cst_9 [1] : vector<32x32xf32> to vector<32xf32>
    %18 = vector.shape_cast %17 : vector<32xf32> to vector<32x1xf32>
    %19 = arith.truncf %16 : vector<32x32xf32> to vector<32x32xbf16>
    %c0_10 = arith.constant 0 : index
    %c0_11 = arith.constant 0 : index
    %20 = vector.load %arg11[%c0_10, %c0_11] : memref<32x1xf32, #tpu.memory_space<vmem>>, vector<32x1xf32>
    %21 = arith.mulf %13, %20 : vector<32x1xf32>
    %22 = arith.addf %21, %18 : vector<32x1xf32>
    %c0_12 = arith.constant 0 : index
    %c0_13 = arith.constant 0 : index
    %23 = vector.load %arg11[%c0_12, %c0_13] : memref<32x1xf32, #tpu.memory_space<vmem>>, vector<32x1xf32>
    tpu.vector_store %arg11[%c0_12, %c0_13], %22 {strides = array<i32>} : memref<32x1xf32, #tpu.memory_space<vmem>>, vector<32x1xf32>,
    %c0_14 = arith.constant 0 : index
    %c0_15 = arith.constant 0 : index
    %24 = vector.load %arg12[%c0_14, %c0_15] : memref<32x128xf32, #tpu.memory_space<vmem>>, vector<32x128xf32>
    %25 = vector.broadcast %13 : vector<32x1xf32> to vector<32x128xf32>
    %26 = arith.mulf %25, %24 : vector<32x128xf32>
    %c0_16 = arith.constant 0 : index
    %c0_17 = arith.constant 0 : index
    %c0_18 = arith.constant 0 : index
    %27 = vector.load %arg5[%c0_16, %c0_17, %c0_18] : memref<1x32x128xbf16, #tpu.memory_space<vmem>>, vector<1x32x128xbf16>
    %28 = vector.shape_cast %27 : vector<1x32x128xbf16> to vector<32x128xbf16>
    %cst_19 = arith.constant dense<0.000000e+00> : vector<32x128xf32>
    %29 = tpu.matmul %19, %28, %cst_19 {dimension_numbers = #tpu.dot_dimension_numbers<[1], [0], [0], [1], [0, 0, 1, 1], [], []>} : vector<32x32xbf16>, vector<32x128xbf16>, vector<32x128xf32> -> vector<32x128xf32>
    %30 = arith.addf %26, %29 : vector<32x128xf32>
    %c0_20 = arith.constant 0 : index
    %c0_21 = arith.constant 0 : index
    %31 = vector.load %arg12[%c0_20, %c0_21] : memref<32x128xf32, #tpu.memory_space<vmem>>, vector<32x128xf32>
    tpu.vector_store %arg12[%c0_20, %c0_21], %30 {strides = array<i32>} : memref<32x128xf32, #tpu.memory_space<vmem>>, vector<32x128xf32>,
    %c0_22 = arith.constant 0 : index
    %c0_23 = arith.constant 0 : index
    %32 = vector.load %arg10[%c0_22, %c0_23] : memref<32x1xf32, #tpu.memory_space<vmem>>, vector<32x1xf32>
    tpu.vector_store %arg10[%c0_22, %c0_23], %11 {strides = array<i32>} : memref<32x1xf32, #tpu.memory_space<vmem>>, vector<32x1xf32>,
    %c0_i32_24 = arith.constant 0 : i32
    %33 = arith.cmpi eq, %arg2, %c0_i32_24 : i32
    %34 = arith.extui %33 : i1 to i32
    %c0_i32_25 = arith.constant 0 : i32
    %35 = arith.cmpi ne, %34, %c0_i32_25 : i32
    scf.if %35 {
      %c0_26 = arith.constant 0 : index
      %c0_27 = arith.constant 0 : index
      %36 = vector.load %arg12[%c0_26, %c0_27] : memref<32x128xf32, #tpu.memory_space<vmem>>, vector<32x128xf32>
      %c0_28 = arith.constant 0 : index
      %c0_29 = arith.constant 0 : index
      %37 = vector.load %arg11[%c0_28, %c0_29] : memref<32x1xf32, #tpu.memory_space<vmem>>, vector<32x1xf32>
      %38 = tpu.reciprocal %37 {approx = true} : vector<32x1xf32> -> vector<32x1xf32>
      %39 = vector.broadcast %38 : vector<32x1xf32> to vector<32x128xf32>
      %40 = arith.mulf %36, %39 : vector<32x128xf32>
      %41 = arith.truncf %40 : vector<32x128xf32> to vector<32x128xbf16>
      %c0_30 = arith.constant 0 : index
      %c0_31 = arith.constant 0 : index
      %42 = vector.load %arg7[%c0_30, %c0_31] : memref<128x128xbf16, #tpu.memory_space<vmem>>, vector<128x128xbf16>
      %cst_32 = arith.constant dense<0.000000e+00> : vector<32x128xf32>
      %43 = tpu.matmul %41, %42, %cst_32 {dimension_numbers = #tpu.dot_dimension_numbers<[1], [0], [0], [1], [0, 0, 1, 1], [], []>} : vector<32x128xbf16>, vector<128x128xbf16>, vector<32x128xf32> -> vector<32x128xf32>
      %c0_33 = arith.constant 0 : index
      %c0_34 = arith.constant 0 : index
      %44 = vector.load %arg8[%c0_33, %c0_34] : memref<1x128xf32, #tpu.memory_space<vmem>>, vector<1x128xf32>
      %45 = vector.broadcast %44 : vector<1x128xf32> to vector<32x128xf32>
      %46 = arith.addf %43, %45 : vector<32x128xf32>
      %c0_35 = arith.constant 0 : index
      %c0_36 = arith.constant 0 : index
      %c0_37 = arith.constant 0 : index
      %47 = vector.load %arg6[%c0_35, %c0_36, %c0_37] : memref<1x32x128xf32, #tpu.memory_space<vmem>>, vector<1x32x128xf32>
      %48 = vector.shape_cast %47 : vector<1x32x128xf32> to vector<32x128xf32>
      %49 = arith.addf %46, %48 : vector<32x128xf32>
      %c0_38 = arith.constant 0 : index
      %c0_39 = arith.constant 0 : index
      %c0_40 = arith.constant 0 : index
      %50 = vector.load %arg9[%c0_38, %c0_39, %c0_40] : memref<1x32x128xf32, #tpu.memory_space<vmem>>, vector<1x32x128xf32>
      %51 = vector.shape_cast %50 : vector<1x32x128xf32> to vector<32x128xf32>
      %52 = vector.shape_cast %49 : vector<32x128xf32> to vector<1x32x128xf32>
      tpu.vector_store %arg9[%c0_38, %c0_39, %c0_40], %52 {strides = array<i32>} : memref<1x32x128xf32, #tpu.memory_space<vmem>>, vector<1x32x128xf32>,
    } else {
    }
    return
  }
  func.func @transform_0(%arg0: i32, %arg1: i32, %arg2: i32) -> (i32, i32, i32) {
    %c0_i32 = arith.constant 0 : i32
    %c0_i32_0 = arith.constant 0 : i32
    return %arg0, %arg1, %c0_i32 : i32, i32, i32
  }
  func.func @transform_1(%arg0: i32, %arg1: i32, %arg2: i32) -> (i32, i32, i32) {
    %c0_i32 = arith.constant 0 : i32
    %c0_i32_0 = arith.constant 0 : i32
    return %arg0, %c0_i32, %arg2 : i32, i32, i32
  }
  func.func @transform_2(%arg0: i32, %arg1: i32, %arg2: i32) -> (i32, i32, i32) {
    %c0_i32 = arith.constant 0 : i32
    %c0_i32_0 = arith.constant 0 : i32
    return %arg0, %arg2, %c0_i32 : i32, i32, i32
  }
  func.func @transform_3(%arg0: i32, %arg1: i32, %arg2: i32) -> (i32, i32, i32) {
    %c0_i32 = arith.constant 0 : i32
    %c0_i32_0 = arith.constant 0 : i32
    return %arg0, %arg1, %c0_i32 : i32, i32, i32
  }
  func.func @transform_4(%arg0: i32, %arg1: i32, %arg2: i32) -> (i32, i32) {
    %c0_i32 = arith.constant 0 : i32
    %c0_i32_0 = arith.constant 0 : i32
    %c0_i32_1 = arith.constant 0 : i32
    return %c0_i32, %c0_i32_0 : i32, i32
  }
  func.func @transform_5(%arg0: i32, %arg1: i32, %arg2: i32) -> (i32, i32) {
    %c0_i32 = arith.constant 0 : i32
    %c0_i32_0 = arith.constant 0 : i32
    %c0_i32_1 = arith.constant 0 : i32
    return %c0_i32, %c0_i32_0 : i32, i32
  }
  func.func @transform_6(%arg0: i32, %arg1: i32, %arg2: i32) -> (i32, i32, i32) {
    %c0_i32 = arith.constant 0 : i32
    %c0_i32_0 = arith.constant 0 : i32
    return %arg0, %arg1, %c0_i32 : i32, i32, i32
  }
}

</mosaic_0001>

<bundles_post_ra>
// kernel: tpu_custom_call.1
= control target key start
LH: loop header
LB: loop body
LE: loop exit
PB: predicated region body
PF: predicated region fallthrough
CT: control target
= control target key end

     0   :  { %11 = vsyncpa [#allocation6], 0  ;;  %s1734_s0 = inlined_call_operand.vmem [shape: bf16[2,32,128], index: 0, kind: input, shape index: {}]   ;;  %s1735_s1 = inlined_call_operand.vmem [shape: bf16[2,128,32], index: 1, kind: input, shape index: {}]   ;;  %s1736_s2 = inlined_call_operand.hbm [shape: bf16[2,32,128], index: 2, kind: input, shape index: {}]   ;;  %s1737_s3 = inlined_call_operand.vmem [shape: f32[2,32,128], index: 3, kind: input, shape index: {}]   ;;  %s1738_s4 = inlined_call_operand.vmem [shape: bf16[128,128], index: 4, kind: input, shape index: {}]   ;;  %s1739_s5 = inlined_call_operand.vmem [shape: f32[1,128], index: 5, kind: input, shape index: {}]   ;;  %s1740_s6 = inlined_call_operand.hbm [shape: f32[2,32,128], index: 6, kind: output, shape index: {}]  }
   0x1   :  { %13 = vsyncpa [#allocation6 + $0x1], 0 }
   0x2   :  { %14 = vsyncpa [#allocation7], 0 }
   0x3   :  { %16 = vsyncpa [#allocation7 + $0x1], 0  ;;  %s1481_s21 = smov 0   ;;  %s1483_s22 = smov 0  }
   0x4   :  { %s1485_s23 = smov 0   ;;  %s1487_s24 = smov 0  }
   0x5   :  { %s1489_s25 = smov 0   ;;  %s1491_s26 = smov 0  }
   0x6 LB: > { %s1087_s27 = sadd.s32 4294967295, %s1435_s26   ;;  %s1088_s28 = sadd.s32 4294967294, %s1435_s26   ;;  %s1435_s26 = sphi %s1491_s26, %s22_s26   ;;  %s1431_s25 = sphi %s1489_s25, %s1755_s25   ;;  %s1427_s24 = sphi %s1487_s24, %s1754_s24   ;;  %s1423_s23 = sphi %s1485_s23, %s1753_s23   ;;  %s1419_s22 = sphi %s1483_s22, %s1752_s22   ;;  %s1415_s21 = sphi %s1481_s21, %s1751_s21  }
   0x7   : > { %s41_s29 = sadd.s32 1, %s1431_s25  ;;  %s106_s30 = sadd.s32 1, %s1423_s23 }
   0x8   : > { %p43_p0 = scmp.ge.s32.totalorder %s41_s29, 2  ;;  %p113_p1 = scmp.ne.s32.totalorder %s1423_s23, %s1419_s22 }
   0x9   : > { %p114_p2 = scmp.eq.s32.totalorder %s1435_s26, 0  ;;  %p119_p3 = scmp.ne.s32.totalorder %s1419_s22, %s1415_s21 }
   0xa   : > { %s1757_s29 = smov (%p43_p0, %s41_s29), 0  ;;  %p120_p5 = scmp.eq.s32.totalorder %s1087_s27, 0 }
   0xb   : > { %p1522_p4 = por %p114_p2, %p113_p1  ;;  %s101_s8 = ssub.s32 %s1431_s25, %s1757_s29 }
   0xc   : > { %p215_p6 = scmp.eq.s32.totalorder %s1087_s27, 1  ;;  %p104_p7 = scmp.eq.s32.totalorder %s101_s8, 0 }
   0xd   : > { %p1528_p8 = por %p120_p5, %p119_p3  ;;  %p221_p10 = scmp.eq.s32.totalorder %s1088_s28, 1 }
   0xe   : > { %p1532_p9 = por %p215_p6, %p113_p1  ;;  %p1220_p13 = scmp.lt.s32.totalorder %s1435_s26, 2 }
   0xf   : > { %s1537_s11 = scalar_select %p104_p7, %s1423_s23, %s106_s30  }
  0x10   : > { %s1744_s10 = scalar_select %p1532_p9, 1, 0 }
  0x11   : > { %p1539_p11 = por %p221_p10, %p119_p3  ;;  %s271_s13 = sand.u32 1, %s1423_s23  }
  0x12   : > { %s1091_s14 = sshll.u32 %s271_s13, 4  ;;  %s1131_s15 = sshll.u32 %s1431_s25, 8 }
  0x13   : > { %s1745_s12 = scalar_select %p1539_p11, 1, 0 }
  0x14   : > { %s1550_s18 = scalar_lea.hbm %s1736_s2, %s1131_s15  ;;  %s275_s19 = scalar_lea.vmem [#allocation5], %s1091_s14 }
  0x15   : > { %s284_s20 = sshll.u32 %s275_s19, 4  ;;  %p1556_p0 = pnand %p1220_p13, %p1522_p4  ;;  %s1552_s20 = int_to_ptr.vmem [resolvable:$true] %s284_s20 }
  0x16   : > { %s1561_s28 = scalar_lea.sflag [#allocation6], %s271_s13  ;;  %s1323_s30 = scalar_lea.hbm %s1550_s18, 256 }
  0x17   : > { %p1324_p2 = scmp.ne.s32.totalorder %s1550_s18, %s1323_s30  ;;  %p1325_p3 = pneg %p1556_p0 }
  0x18   : > { %s1328_s7 = scalar_lea.hbm %s1736_s2, 512  ;;  %p1329_p4 = scmp.lt.u32.totalorder %s1550_s18, %s1736_s2 }
  0x19   : > { %p1326_p5 = pnand %p1325_p3, %p1324_p2  ;;  %p1330_p7 = scmp.lt.u32.totalorder %s1328_s7, %s1323_s30 }
  0x1a   : > { %p1332_p13 = scmp.lt.u32.totalorder %s1323_s30, %s1550_s18 }
  0x1b   : > { %p1327_p6 = pneg %p1326_p5  ;;  %p1331_p10 = por %p1330_p7, %p1329_p4 }
  0x1d   : > { %p1333_p12 = por %p1332_p13, %p1331_p10 }
  0x1f   : > { %p1334_p1 = pnand %p1333_p12, %p1327_p6 }
  0x21   : > { %1337 = shalt.err (!%p1334_p1)
}
  0x22   : > { %s1338_s13 = scalar_lea.vmem %s1552_s20, 256  ;;  %s1437_s17 = smov [#allocation5]  }
  0x23   : > { %p1339_p2 = scmp.ne.s32.totalorder %s1552_s20, %s1338_s13  ;;  %s1343_s19 = sshll.u32 %s1437_s17, 4  ;;  %s1344_s19 = int_to_ptr.vmem [resolvable:$false] %s1343_s19 }
  0x24   : > { %s1345_s8 = scalar_lea.vmem %s1344_s19, 512  ;;  %p1346_p9 = scmp.lt.s32.totalorder %s1552_s20, %s1344_s19 }
  0x25   : > { %p1341_p5 = pnand %p1339_p2, %p1325_p3  ;;  %p1347_p4 = scmp.lt.s32.totalorder %s1345_s8, %s1338_s13 }
  0x27   : > { %p1342_p11 = pneg %p1341_p5  ;;  %p1348_p7 = por %p1347_p4, %p1346_p9 }
  0x29   : > { %p1349_p10 = pnand %p1348_p7, %p1342_p11 }
  0x2b   : > { %1352 = shalt.err (!%p1349_p10)
}
  0x2c   : > { %s1438_s30 = smov 64   ;;  %s1439_s14 = smov 4  }
  0x2d   : > { %1215 = dma.hbm_to_vmem [thread:$0]  (!%p1556_p0), %s1550_s18, 256, %s1552_s20, %s1561_s28, %s1438_s30, %s1438_s30, %s1439_s14  }
  0x2e   : > { %p305_p12 = scmp.lt.s32.totalorder %s1435_s26, 3  ;;  %p1747_p1 = scmp.ge.s32.totalorder %s1435_s26, 1 }
  0x30   : > { %p306_p3 = pnand %p1747_p1, %p305_p12 }
  0x31   : > { %s1593_s7 = sand.u32 (!%p306_p3), 1, %s1419_s22  }
  0x32   : > { %309 = sbr.rel (%p306_p3) target bundleno = 1136 (0x470), region = 44  ;;  %s1095_s15 = sshll.u32 (!%p306_p3), %s1593_s7, 4 }
  0x33   : > { %s312_s16 = scalar_lea.sflag (!%p306_p3), [#allocation6], %s1593_s7  ;;  %s1597_s13 = scalar_lea.vmem (!%p306_p3), [#allocation5], %s1095_s15 }
  0x39   : > { %1406 = dma.done.wait (%p1528_p8), %s312_s16, 256  }
  0x3a   : > { %1408 = vsyncadd (%p1528_p8), %s312_s16, 4294967040  ;;  %p371_p9 = scmp.lt.s32.totalorder %s1427_s24, 1  ;;  %vm405_vm0 = vcmask 7168   ;;  %v1440_v10 = vmov -1e+30   ;;  %vm551_vm1 = vcmask 261120  }
  0x3b   : > { %408 = vst.msk [vmem:[#allocation2 + $0x10] sm:$0xff] %vm405_vm0, %v1440_v10  ;;  %406 = vst.msk [vmem:[#allocation2] sm:$0xff] %vm405_vm0, %v1440_v10  ;;  %v1441_v19 = vmov 0   ;;  %v1442_v20 = vmov 0.0   ;;  %v1289_v37 = vld [vmem:[%s1597_s13] sm:$0xff]   ;;  %v1290_v38 = vld [vmem:[%s1597_s13 + $0x8] sm:$0xff]  }
  0x3c   : > { %s1605_s18 = scalar_select %p371_p9, %s1427_s24, 1  ;;  %407 = vst.msk [vmem:[#allocation2 + $0x8] sm:$0xff] %vm405_vm0, %v1440_v10  ;;  %409 = vst.msk [vmem:[#allocation2 + $0x18] sm:$0xff] %vm405_vm0, %v1440_v10  ;;  %1278 = vset.pattern.permute.xlu1 %v1441_v19  ;;  %1277 = vset.pattern.permute.xlu0 %v1441_v19 }
  0x3d   : > { %410 = vst.msk [vmem:[#allocation3] sm:$0xff] %vm405_vm0, %v1442_v20  ;;  %411 = vst.msk [vmem:[#allocation3 + $0x8] sm:$0xff] %vm405_vm0, %v1442_v20  ;;  %1180 = vmatprep.subr.bf16.mxu1 %v1289_v37  ;;  %s1096_s27 = sshll.u32 %s1593_s7, 5  ;;  %p1748_p11 = scmp.ne.s32.totalorder %s1744_s10, 0 }
  0x3e   : > { %s1133_s20 = sshll.u32 %s1605_s18, 6  ;;  %s1132_s19 = sshll.u32 %s1605_s18, 4  ;;  %412 = vst.msk [vmem:[#allocation3 + $0x10] sm:$0xff] %vm405_vm0, %v1442_v20  ;;  %413 = vst.msk [vmem:[#allocation3 + $0x18] sm:$0xff] %vm405_vm0, %v1442_v20  ;;  %1181 = vmatpush3.bf16.msra.mxu1 %v1289_v37 }
  0x3f   : > { %s387_s17 = scalar_lea.vmem %s1735_s1, %s1133_s20  ;;  %s378_s30 = scalar_lea.vmem %s1734_s0, %s1132_s19  ;;  %1182 = vmatprep.subr.bf16.mxu1 %v1290_v38 }
  0x40   : > { %v1279_v0 = vld [vmem:[%s387_s17] sm:$0xff]   ;;  %v1280_v1 = vld [vmem:[%s387_s17 + $0x8] sm:$0xff]   ;;  %v1281_v2 = vld [vmem:[%s387_s17 + $0x10] sm:$0xff]   ;;  %s1134_s20 = sshll.u32 %s1605_s18, 5  ;;  %s1135_s18 = sshll.u32 %s1427_s24, 9 }
  0x41   : > { %1160 = vmatprep.subr.bf16.mxu0 %v1279_v0  ;;  %v1282_v3 = vld [vmem:[%s387_s17 + $0x18] sm:$0xff]   ;;  %v1287_v4 = vld [vmem:[%s378_s30] sm:$0xff]   ;;  %v1284_v6 = vld [vmem:[%s387_s17 + $0x28] sm:$0xff]   ;;  %s397_s19 = scalar_lea.vmem %s1737_s3, %s1134_s20  ;;  %s1685_s13 = scalar_lea.hbm %s1740_s6, %s1135_s18 }
  0x42   : > { %1161 = vmatpush3.bf16.msra.mxu0 %v1279_v0  ;;  %v1283_v5 = vld [vmem:[%s387_s17 + $0x20] sm:$0xff]   ;;  %1176 = vmatprep.mubr.bf16.mxu0 %v1287_v4  ;;  %v1285_v7 = vld [vmem:[%s387_s17 + $0x30] sm:$0xff]   ;;  %v1286_v8 = vld [vmem:[%s387_s17 + $0x38] sm:$0xff]   ;;  %s928_s24 = scalar_lea.sflag [#allocation7], %s1593_s7 }
  0x43   : > { %1162 = vmatprep.subr.bf16.mxu0 %v1280_v1  ;;  %v1288_v9 = vld [vmem:[%s378_s30 + $0x8] sm:$0xff]   ;;  %v1627_v21 = vld [vmem:[#allocation2 + $0x10] sm:$0xff]  ;;  %v547_v22 = vld [vmem:[#allocation2] sm:$0xff]  ;;  %1183 = vmatpush3.bf16.msra.mxu1 %v1290_v38  ;;  %s369_s30 = scalar_lea.vmem [#allocation8], %s1096_s27  ;;  %s1443_s27 = smov [#allocation8]  }
  0x44   : > { %v550_v27 = vld [vmem:[#allocation2 + $0x18] sm:$0xff]  ;;  %v548_v29 = vld [vmem:[#allocation2 + $0x8] sm:$0xff]  ;;  %v626_v10 = vld [vmem:[#allocation3] sm:$0xff]  ;;  %s943_s14 = sshll.u32 %s369_s30, 4  ;;  %s1357_s28 = sshll.u32 %s1443_s27, 4  ;;  %s1680_s14 = int_to_ptr.vmem [resolvable:$true] %s943_s14  ;;  %s1358_s28 = int_to_ptr.vmem [resolvable:$false] %s1357_s28 }
  0x45   : > { %v629_v20 = vld [vmem:[#allocation3 + $0x18] sm:$0xff]  ;;  %s1353_s20 = scalar_lea.vmem %s1680_s14, 512  ;;  %s1359_s17 = scalar_lea.vmem %s1358_s28, 1024 }
  0x46   : > { %1163 = vmatpush3.bf16.msra.mxu0 %v1280_v1  ;;  %p1354_p8 = scmp.ne.s32.totalorder %s1680_s14, %s1353_s20  ;;  %p1360_p13 = scmp.lt.s32.totalorder %s1680_s14, %s1358_s28 }
  0x47   : > { %1164 = vmatprep.subr.bf16.mxu0 %v1281_v2  ;;  %p1361_p2 = scmp.lt.s32.totalorder %s1359_s17, %s1353_s20 }
  0x48   : > { %p1355_p0 = pnand %p1354_p8, %p1748_p11 }
  0x49   : > { %p1362_p5 = por %p1361_p2, %p1360_p13 }
  0x4a   : > { %1165 = vmatpush3.bf16.msra.mxu0 %v1281_v2  ;;  %p1356_p6 = pneg %p1355_p0 }
  0x4b   : > { %1166 = vmatprep.subr.bf16.mxu0 %v1282_v3 }
  0x4c   : > { %p1363_p4 = pnand %p1362_p5, %p1356_p6 }
  0x4e   : > { %1167 = vmatpush3.bf16.msra.mxu0 %v1282_v3 }
  0x4f   : > { %1168 = vmatprep.subr.bf16.mxu0 %v1283_v5 }
  0x52   : > { %1169 = vmatpush3.bf16.msra.mxu0 %v1283_v5  ;;  %v1291_v5 = vld [vmem:[%s1738_s4] sm:$0xff]  }
  0x53   : > { %1170 = vmatprep.subr.bf16.mxu0 %v1284_v6  ;;  %1188 = vmatprep.subr.bf16.mxu1 %v1291_v5 }
  0x56   : > { %1171 = vmatpush3.bf16.msra.mxu0 %v1284_v6  ;;  %v1292_v6 = vld [vmem:[%s1738_s4 + $0x8] sm:$0xff]  }
  0x57   : > { %1172 = vmatprep.subr.bf16.mxu0 %v1285_v7 }
  0x5a   : > { %1173 = vmatpush3.bf16.msra.mxu0 %v1285_v7  ;;  %v1293_v7 = vld [vmem:[%s1738_s4 + $0x10] sm:$0xff]  }
  0x5b   : > { %1174 = vmatprep.subr.bf16.mxu0 %v1286_v8 }
  0x5e   : > { %1175 = vmatpush3.bf16.msra.mxu0 %v1286_v8  ;;  %v1294_v8 = vld [vmem:[%s1738_s4 + $0x18] sm:$0xff]  }
  0x61   : > { %1177 = vmatmul.mubr.bf16.vlgmr.msra.gmra.mrb[0].mxu0 %v1288_v9  ;;  %v1295_v9 = vld [vmem:[%s1738_s4 + $0x20] sm:$0xff]  }
 0x134   : > { %v1178_v11 = vpop.f32.mrb[0].mxu0 }
 0x135   : > { %v532_v12 = vpop.f32.mrb[1].mxu0  ;;  %v558_v13 = vsel %vm551_vm1, %v1178_v11, -inf }
 0x136   : > { %559 = vmax.xlane.f32.xlu1 %v558_v13  ;;  %v1179_v14 = vpop.f32.mrb[2].mxu0  ;;  %v552_v15 = vsel %vm551_vm1, %v532_v12, -inf  ;;  %v628_v13 = vld [vmem:[#allocation3 + $0x10] sm:$0xff] }
 0x137   : > { %553 = vmax.xlane.f32.xlu0 %v552_v15  ;;  %v535_v16 = vpop.f32.mrb[3].mxu0  ;;  %v561_v17 = vsel %vm551_vm1, %v1179_v14, -inf }
 0x138   : > { %v555_v18 = vsel %vm551_vm1, %v535_v16, -inf }
 0x13a   : > { %562 = vmax.xlane.f32.xlu1 %v561_v17 }
 0x13b   : > { %556 = vmax.xlane.f32.xlu0 %v555_v18 }
 0x1c3   : > { %v560_v23 = vpop.xlane.xlu1 %559 }
 0x1c4   : > { %v566_v24 = vmax.f32 %v1627_v21, %v560_v23  ;;  %v554_v25 = vpop.xlane.xlu0 %553 }
 0x1c5   : > { %v564_v26 = vmax.f32 %v547_v22, %v554_v25 }
 0x1c6   : > { %v570_v28 = vsub.f32 %v1627_v21, %v566_v24  ;;  %752 = vst.msk [vmem:[#allocation2 + $0x10] sm:$0xff] %vm405_vm0, %v566_v24  ;;  %592 = vperm.xlu1 %1278, %v566_v24  }
 0x1c7   : > { %v568_v30 = vsub.f32 %v547_v22, %v564_v26  ;;  %750 = vst.msk [vmem:[#allocation2] sm:$0xff] %vm405_vm0, %v564_v26  ;;  %v563_v31 = vpop.xlane.xlu1 %562  ;;  %582 = vperm.xlu0 %1277, %v564_v26  }
 0x1c8   : > { %v567_v32 = vmax.f32 %v550_v27, %v563_v31  ;;  %v557_v33 = vpop.xlane.xlu0 %556  ;;  %v576_v63 = vmul.f32 1.442695, %v570_v28  ;;  %v1296_v31 = vld [vmem:[%s1738_s4 + $0x28] sm:$0xff]  }
 0x1c9   : > { %v565_v34 = vmax.f32 %v548_v29, %v557_v33  ;;  %v572_v61 = vmul.f32 1.442695, %v568_v30  ;;  %v1297_v33 = vld [vmem:[%s1738_s4 + $0x30] sm:$0xff]  }
 0x1ca   : > { %v571_v35 = vsub.f32 %v550_v27, %v567_v32  ;;  %753 = vst.msk [vmem:[#allocation2 + $0x18] sm:$0xff] %vm405_vm0, %v567_v32 }
 0x1cb   : > { %v569_v36 = vsub.f32 %v548_v29, %v565_v34  ;;  %751 = vst.msk [vmem:[#allocation2 + $0x8] sm:$0xff] %vm405_vm0, %v565_v34  ;;  %587 = vperm.xlu1 %1278, %v565_v34  }
 0x1cc   : > { %v578_v0 = vmul.f32 1.442695, %v571_v35 }
 0x1cd   : > { %v574_v62 = vmul.f32 1.442695, %v569_v36  ;;  %v1298_v36 = vld [vmem:[%s1738_s4 + $0x38] sm:$0xff]  }
 0x1cf   : > { %597 = vperm.xlu1 %1278, %v567_v32  }
 0x245   : > { %v593_v39 = vpop.permute.xlu1 %592 }
 0x246   : > { %v602_v40 = vsub.f32 %v1178_v11, %v593_v39  ;;  %v583_v41 = vpop.permute.xlu0 %582 }
 0x247   : > { %v600_v42 = vsub.f32 %v532_v12, %v583_v41 }
 0x248   : > { %v608_v43 = vmul.f32 1.442695, %v602_v40 }
 0x249   : > { %v604_v44 = vmul.f32 1.442695, %v600_v42 }
 0x24a   : > { %v588_v45 = vpop.permute.xlu1 %587 }
 0x24b   : > { %1299 = vpow2.f32 %v604_v44  ;;  %v601_v46 = vsub.f32 %v535_v16, %v588_v45 }
 0x24c   : > { %1301 = vpow2.f32 %v608_v43 }
 0x24d   : > { %v606_v47 = vmul.f32 1.442695, %v601_v46 }
 0x24e   : > { %v598_v48 = vpop.permute.xlu1 %597 }
 0x24f   : > { %1303 = vpow2.f32 %v606_v47  ;;  %v603_v49 = vsub.f32 %v1179_v14, %v598_v48  ;;  %v627_v14 = vld [vmem:[#allocation3 + $0x8] sm:$0xff] }
 0x251   : > { %v610_v50 = vmul.f32 1.442695, %v603_v49 }
 0x253   : > { %1305 = vpow2.f32 %v610_v50 }
 0x254   : > { %1307 = vpow2.f32 %v572_v61 }
 0x255   : > { %v1300_v51 = vpop.eup %1299  ;;  %1309 = vpow2.f32 %v574_v62 }
 0x256   : > { %v612_v52 = vsel %vm551_vm1, %v1300_v51, 0.0  ;;  %v1302_v53 = vpop.eup %1301  ;;  %1311 = vpow2.f32 %v576_v63  ;;  %v1117_v63 = vld [vmem:[%s1739_s5] ss:$0 sm:$0xff] }
 0x257   : > { %613 = vadd.xlane.f32.xlu1 %v612_v52  ;;  %v618_v56 = vsel %vm551_vm1, %v1302_v53, 0.0  ;;  %1313 = vpow2.f32 %v578_v0 }
 0x259   : > { %v1304_v54 = vpop.eup %1303 }
 0x25a   : > { %v615_v55 = vsel %vm551_vm1, %v1304_v54, 0.0  ;;  %v624_v57 = vpack.c.bf16 %v1304_v54, %v1300_v51 }
 0x25b   : > { %616 = vadd.xlane.f32.xlu0 %v615_v55  ;;  %619 = vadd.xlane.f32.xlu1 %v618_v56 }
 0x25c   : > { %1184 = vmatprep.mubr.msk.bf16.mxu1 %vm551_vm1, %v624_v57 }
 0x25d   : > { %v1306_v58 = vpop.eup %1305 }
 0x25e   : > { %v621_v59 = vsel %vm551_vm1, %v1306_v58, 0.0  ;;  %v625_v60 = vpack.c.bf16 %v1306_v58, %v1302_v53  ;;  %v1308_v1 = vpop.eup %1307 }
 0x25f   : > { %622 = vadd.xlane.f32.xlu1 %v621_v59  ;;  %v1310_v2 = vpop.eup %1309  ;;  %v630_v11 = vmul.f32 %v1308_v1, %v626_v10 }
 0x260   : > { %1185 = vmatmul.mubr.msk.bf16.vlgmr.msra.gmra.mrb[0].mxu1 %vm551_vm1, %v625_v60  ;;  %v1312_v3 = vpop.eup %1311  ;;  %v631_v17 = vmul.f32 %v1310_v2, %v627_v14 }
 0x261   : > { %v1314_v4 = vpop.eup %1313  ;;  %1189 = vmatpush3.bf16.msra.mxu1 %v1291_v5  ;;  %v632_v16 = vmul.f32 %v1312_v3, %v628_v13 }
 0x262   : > { %1190 = vmatprep.subr.bf16.mxu1 %v1292_v6  ;;  %v633_v23 = vmul.f32 %v1314_v4, %v629_v20 }
 0x265   : > { %1191 = vmatpush3.bf16.msra.mxu1 %v1292_v6 }
 0x266   : > { %1192 = vmatprep.subr.bf16.mxu1 %v1293_v7 }
 0x269   : > { %1193 = vmatpush3.bf16.msra.mxu1 %v1293_v7  ;;  %v918_v7 = vld [vmem:[%s397_s19 + $0x18] sm:$0xff] }
 0x26a   : > { %1194 = vmatprep.subr.bf16.mxu1 %v1294_v8 }
 0x26d   : > { %1195 = vmatpush3.bf16.msra.mxu1 %v1294_v8 }
 0x26e   : > { %1196 = vmatprep.subr.bf16.mxu1 %v1295_v9 }
 0x270   : > { %649 = vperm.xlu1 %1278, %v1308_v1   ;;  %v917_v1 = vld [vmem:[%s397_s19 + $0x10] sm:$0xff] }
 0x271   : > { %654 = vperm.xlu0 %1277, %v1310_v2   ;;  %1197 = vmatpush3.bf16.msra.mxu1 %v1295_v9 }
 0x272   : > { %1198 = vmatprep.subr.bf16.mxu1 %v1296_v31 }
 0x274   : > { %659 = vperm.xlu1 %1278, %v1312_v3  }
 0x275   : > { %1199 = vmatpush3.bf16.msra.mxu1 %v1296_v31 }
 0x276   : > { %1200 = vmatprep.subr.bf16.mxu1 %v1297_v33 }
 0x278   : > { %664 = vperm.xlu1 %1278, %v1314_v4   ;;  %v915_v4 = vld [vmem:[%s397_s19] sm:$0xff] }
 0x279   : > { %1201 = vmatpush3.bf16.msra.mxu1 %v1297_v33 }
 0x27a   : > { %1202 = vmatprep.subr.bf16.mxu1 %v1298_v36 }
 0x27d   : > { %1203 = vmatpush3.bf16.msra.mxu1 %v1298_v36 }
 0x2e4   : > { %v614_v12 = vpop.xlane.xlu1 %613 }
 0x2e5   : > { %v634_v15 = vadd.f32 %v630_v11, %v614_v12  ;;  %v916_v11 = vld [vmem:[%s397_s19 + $0x8] sm:$0xff] }
 0x2e7   : > { %639 = vst.msk [vmem:[#allocation3] sm:$0xff] %vm405_vm0, %v634_v15 }
 0x2e8   : > { %v620_v18 = vpop.xlane.xlu1 %619  ;;  %v617_v19 = vpop.xlane.xlu0 %616 }
 0x2e9   : > { %v636_v21 = vadd.f32 %v632_v16, %v620_v18  ;;  %v635_v22 = vadd.f32 %v631_v17, %v617_v19 }
 0x2eb   : > { %641 = vst.msk [vmem:[#allocation3 + $0x10] sm:$0xff] %vm405_vm0, %v636_v21  ;;  %640 = vst.msk [vmem:[#allocation3 + $0x8] sm:$0xff] %vm405_vm0, %v635_v22 }
 0x2ec   : > { %v623_v24 = vpop.xlane.xlu1 %622 }
 0x2ed   : > { %v637_v25 = vadd.f32 %v633_v23, %v623_v24 }
 0x2ee   : > { %v761_v26 = vld [vmem:[#allocation3] sm:$0xff] }
 0x2ef   : > { %642 = vst.msk [vmem:[#allocation3 + $0x18] sm:$0xff] %vm405_vm0, %v637_v25  ;;  %1315 = vrcp.f32 %v761_v26 }
 0x2f0   : > { %v650_v41 = vpop.permute.xlu1 %649  ;;  %v655_v44 = vpop.permute.xlu0 %654 }
 0x2f1   : > { %v668_v46 = vmul.f32 0.0, %v655_v44  ;;  %v667_v47 = vmul.f32 0.0, %v650_v41 }
 0x2f2   : > { %v762_v27 = vld [vmem:[#allocation3 + $0x8] sm:$0xff]  ;;  %v763_v28 = vld [vmem:[#allocation3 + $0x10] sm:$0xff] }
 0x2f3   : > { %1317 = vrcp.f32 %v762_v27 }
 0x2f4   : > { %1319 = vrcp.f32 %v763_v28  ;;  %v660_v42 = vpop.permute.xlu1 %659 }
 0x2f5   : > { %v669_v51 = vmul.f32 0.0, %v660_v42 }
 0x2f6   : > { %v764_v29 = vld [vmem:[#allocation3 + $0x18] sm:$0xff] }
 0x2f7   : > { %1321 = vrcp.f32 %v764_v29 }
 0x2f8   : > { %v665_v43 = vpop.permute.xlu1 %664 }
 0x2f9   : > { %v1316_v30 = vpop.eup %1315  ;;  %v670_v52 = vmul.f32 0.0, %v665_v43 }
 0x2fa   : > { %771 = vperm.xlu1 %1278, %v1316_v30  }
 0x2fd   : > { %v1318_v32 = vpop.eup %1317 }
 0x2fe   : > { %v1320_v34 = vpop.eup %1319  ;;  %776 = vperm.xlu0 %1277, %v1318_v32  }
 0x2ff   : > { %781 = vperm.xlu1 %1278, %v1320_v34  }
 0x301   : > { %v1322_v35 = vpop.eup %1321 }
 0x302   : > { %786 = vperm.xlu0 %1277, %v1322_v35  }
 0x333   : > { %v1186_v37 = vpop.f32.mrb[0].mxu1 }
 0x334   : > { %v727_v38 = vpop.f32.mrb[1].mxu1  ;;  %v744_v56 = vadd.f32 %v1186_v37, %v669_v51 }
 0x335   : > { %v1187_v39 = vpop.f32.mrb[2].mxu1  ;;  %v742_v48 = vadd.f32 %v727_v38, %v667_v47 }
 0x336   : > { %v730_v40 = vpop.f32.mrb[3].mxu1  ;;  %v745_v57 = vadd.f32 %v1187_v39, %v670_v52 }
 0x337   : > { %v743_v49 = vadd.f32 %v730_v40, %v668_v46 }
 0x379   : > { %v772_v45 = vpop.permute.xlu1 %771 }
 0x37a   : > { %v789_v53 = vmul.f32 %v772_v45, %v742_v48 }
 0x37d   : > { %v777_v50 = vpop.permute.xlu0 %776 }
 0x37e   : > { %v790_v54 = vmul.f32 %v777_v50, %v743_v49  ;;  %v782_v55 = vpop.permute.xlu1 %781 }
 0x37f   : > { %v791_v60 = vmul.f32 %v782_v55, %v744_v56 }
 0x380   : > { %v793_v58 = vpack.c.bf16 %v790_v54, %v789_v53 }
 0x381   : > { %v787_v59 = vpop.permute.xlu0 %786 }
 0x382   : > { %v792_v61 = vmul.f32 %v787_v59, %v745_v57  ;;  %1204 = vmatprep.mubr.bf16.mxu1 %v793_v58 }
 0x384   : > { %v794_v62 = vpack.c.bf16 %v792_v61, %v791_v60 }
 0x386   : > { %1205 = vmatmul.mubr.bf16.vlgmr.msra.gmra.mrb[4].mxu1 %v794_v62 }
 0x459   : > { %v1206_v0 = vpop.f32.mrb[4].mxu1 }
 0x45a   : > { %v909_v2 = vadd.f32 %v1206_v0, %v1117_v63  ;;  %v900_v3 = vpop.f32.mrb[5].mxu1 }
 0x45b   : > { %v901_v5 = vadd.f32 %v1117_v63, %v900_v3  ;;  %v1207_v6 = vpop.f32.mrb[6].mxu1 }
 0x45c   : > { %v921_v8 = vadd.f32 %v917_v1, %v909_v2  ;;  %v912_v9 = vadd.f32 %v1207_v6, %v1117_v63  ;;  %v903_v10 = vpop.f32.mrb[7].mxu1 }
 0x45d   : > { %v919_v12 = vadd.f32 %v915_v4, %v901_v5  ;;  %v904_v13 = vadd.f32 %v1117_v63, %v903_v10 }
 0x45e   : > { %925 = vst [vmem:[%s369_s30 + $0x10] sm:$0xff] %v921_v8  ;;  %v922_v14 = vadd.f32 %v918_v7, %v912_v9 }
 0x45f   : > { %923 = vst [vmem:[%s369_s30] sm:$0xff] %v919_v12  ;;  %v920_v15 = vadd.f32 %v916_v11, %v904_v13 }
 0x460   : > { %926 = vst [vmem:[%s369_s30 + $0x18] sm:$0xff] %v922_v14 }
 0x461   : > { %924 = vst [vmem:[%s369_s30 + $0x8] sm:$0xff] %v920_v15 }
 0x462   : > { %1366 = shalt.err (!%p1363_p4)
}
 0x463   : > { %s1367_s19 = scalar_lea.hbm %s1685_s13, 512  ;;  %s1371_s30 = scalar_lea.hbm %s1740_s6, 1024 }
 0x464   : > { %p1368_p7 = scmp.ne.s32.totalorder %s1685_s13, %s1367_s19  ;;  %p1372_p1 = scmp.lt.u32.totalorder %s1685_s13, %s1740_s6 }
 0x465   : > { %p1373_p3 = scmp.lt.u32.totalorder %s1371_s30, %s1367_s19  ;;  %p1375_p8 = scmp.lt.u32.totalorder %s1367_s19, %s1685_s13 }
 0x466   : > { %p1369_p10 = pnand %p1368_p7, %p1748_p11 }
 0x467   : > { %p1374_p9 = por %p1373_p3, %p1372_p1 }
 0x468   : > { %p1370_p12 = pneg %p1369_p10 }
 0x469   : > { %p1376_p0 = por %p1375_p8, %p1374_p9 }
 0x46b   : > { %p1377_p6 = pnand %p1376_p0, %p1370_p12 }
 0x46d   : > { %1380 = shalt.err (!%p1377_p6)
}
 0x46e   : > { %s1444_s16 = smov 128   ;;  %s1445_s20 = smov 8  }
 0x46f   : > { %1210 = dma.vmem_to_hbm [thread:$0]  (%p1748_p11), %s1680_s14, 512, %s1685_s13, %s928_s24, %s1444_s16, %s1444_s16, %s1445_s20  }
 0x470 PF: > { %s958_s27 = sand.u32 1, %s1415_s21   ;;  %p1749_p13 = scmp.ne.s32.totalorder %s1745_s12, 0 }
 0x471   : > { %p1750_p2 = scmp.ge.s32.totalorder %s1435_s26, 2  ;;  %s959_s28 = scalar_lea.sflag [#allocation7], %s958_s27 }
 0x473   : > { %p1217_p5 = pnand %p1750_p2, %p1749_p13 }
 0x475   : > { %1410 = dma.done.wait (!%p1217_p5), %s959_s28, 512  }
 0x476   : > { %1412 = vsyncadd (!%p1217_p5), %s959_s28, 4294966784  ;;  %s22_s26 = sadd.s32 1, %s1435_s26   ;;  %s1751_s21 = smov %s1419_s22 }
 0x477   : > { %p19_p4 = scmp.ge.s32.totalorder %s22_s26, 4   ;;  %s1752_s22 = smov %s1423_s23 }
 0x478   : > { %s1753_s23 = smov %s1537_s11  ;;  %s1754_s24 = smov %s1431_s25 }
 0x479   : > { %s1755_s25 = smov %s1757_s29  ;;  %21 = sbr.rel (!%p19_p4) target bundleno = 6 (0x6), region = 106 }
 0x480   :  { %964 = vsyncpa [#allocation6], 1 }
 0x481   :  { %966 = vsyncpa [#allocation6 + $0x1], 1 }
 0x482   :  { %967 = vsyncpa [#allocation7], 1 }
 0x483   :  { %969 = vsyncpa [#allocation7 + $0x1], 1 }

</bundles_post_ra>
